<compile_context>
chip_gen: v7x
topology: tpu7x:2x2x1
jax: 0.10.0
libtpu: 0.0.40
codegen_flags: <defaults>
</compile_context>

<pallas_src>
import functools

import jax
import jax.numpy as jnp
from jax.experimental import pallas as pl
from jax.experimental.pallas import tpu as pltpu


def _round_up(x, m):
    return ((x + m - 1) // m) * m


def _attention_kernel(memT_ref, shift_ref, q_ref, wm_ref, wq_ref, wf_ref,
                      bsum_ref, v_ref, w_out_ref, ctx_out_ref,
                      *, b_block, n_taps, t_valid):
    # memT_ref : (b_block, De, Tp)   memory, transposed, zero padded
    # shift_ref: (b_block, K,  Tp)   pre-shifted conv taps (T on lanes)
    # q_ref    : (b_block, 1,  Dq)   decoder query
    # wm_ref   : (D, De)             memory_layer weight
    # wq_ref   : (D, Dq)             query_layer weight
    # wf_ref   : (K, D, 1)           fused conv*dense tap columns
    # bsum_ref : (D, 1)              b_q + b_m + dense_w @ conv_b
    # v_ref    : (D, 1)              v-layer weight (bias cancels in softmax)
    # w_out_ref  : (b_block, 1, Tp)  attention weights (lane-dense rows)
    # ctx_out_ref: (b_block, De, 1)  attention context (tiny column per batch)
    wm = wm_ref[...]
    wq = wq_ref[...]
    bsum = bsum_ref[...]
    v = v_ref[...]
    tp = memT_ref.shape[2]
    t_idx = jax.lax.broadcasted_iota(jnp.int32, (1, tp), 1)

    for bi in range(b_block):                       # small static unroll
        mem_t = memT_ref[bi]                        # (De, Tp)

        # key = W_m @ memory^T  -> (D, Tp) on the MXU (the only real matmul)
        key = jnp.dot(wm, mem_t, preferred_element_type=jnp.float32)

        # query projection -> (D, 1) column via VPU mul + lane reduction
        q_row = q_ref[bi]                           # (1, Dq)
        q_col = jnp.sum(wq * q_row, axis=1, keepdims=True)          # (D, 1)

        # location term: K fused taps, (D, Tp) accumulator, T stays on lanes
        loc = jnp.zeros_like(key)
        for k in range(n_taps):
            tap_w = wf_ref[k]                       # (D, 1) sublane column
            tap_x = shift_ref[bi, k:k + 1, :]       # (1, Tp) sublane row
            loc = loc + tap_w * tap_x               # broadcast FMA on the VPU

        # energies (v-layer bias dropped: softmax is shift invariant)
        s = jnp.tanh(key + loc + q_col + bsum)      # (D, Tp)  EUP
        e = jnp.sum(s * v, axis=0, keepdims=True)   # (1, Tp)  sublane reduce
        e = jnp.where(t_idx < t_valid, e, -1e30)    # mask padded time steps

        # softmax over the lane (time) axis
        m = jnp.max(e, axis=1, keepdims=True)
        p = jnp.exp(e - m)
        l = jnp.sum(p, axis=1, keepdims=True)
        w = p / l                                   # (1, Tp)
        w_out_ref[bi] = w.astype(w_out_ref.dtype)

        # context = sum_t w[t] * memory[t, :]  -> (De, 1) column (tiny output)
        ctx = jnp.sum(mem_t * w, axis=1, keepdims=True)
        ctx_out_ref[bi] = ctx.astype(ctx_out_ref.dtype)


def attention_forward(query, memory, attn_cum, params, *, b_block=None):
    """query: (B, Dq); memory: (B, T, De); attn_cum: (B, 1, T).

    params = (wq (D,Dq), bq (D,), wm (D,De), bm (D,), conv_w (F,1,K),
              conv_b (F,), dense_w (D,F), v_w (1,D), v_b (1,))
    Returns (attention_context (B, De), attention_weights (B, T)).
    """
    wq, bq, wm, bm, conv_w, conv_b, dense_w, v_w, v_b = params
    B, Dq = query.shape
    _, T, De = memory.shape
    D = wq.shape[0]
    F, _, K = conv_w.shape
    assert K % 2 == 1, "conv kernel size must be odd (PyTorch padding=(K-1)//2)"
    pad = (K - 1) // 2
    f32 = jnp.float32

    # ---- padded sizes: T (lane axis) to 128, sublane axes to 8 ----------------
    Tp = _round_up(T, 128)
    Dp = _round_up(D, 8)
    Dep = _round_up(De, 8)
    Dqp = _round_up(Dq, 8)

    # ---- batch blocking: big blocks, but >= 2 grid steps for v7x's 2 TCs ------
    if b_block is None:
        per_batch_bytes = 4 * (Dep * Tp + K * Tp + Dqp + Tp + Dep)
        budget = 8 * 1024 * 1024                      # block budget (x2 buffered)
        b_block = max(1, min(-(-B // 2), budget // max(per_batch_bytes, 1)))
    n_steps = -(-B // b_block)
    Bp = n_steps * b_block

    # ---- parameter folding (wrapper-side; exact up to f32 reassociation) ------
    w_fused = jnp.einsum('df,fk->kd', dense_w, conv_w[:, 0, :])      # (K, D)
    b_fused = dense_w @ conv_b                                       # (D,)
    b_sum = bq + bm + b_fused                                        # (D,)

    wf_p = jnp.zeros((K, Dp, 1), f32).at[:, :D, 0].set(w_fused)
    bsum_p = jnp.zeros((Dp, 1), f32).at[:D, 0].set(b_sum)
    v_p = jnp.zeros((Dp, 1), f32).at[:D, 0].set(v_w[0])
    wm_p = jnp.zeros((Dp, Dep), f32).at[:D, :De].set(wm.astype(f32))
    wq_p = jnp.zeros((Dp, Dqp), f32).at[:D, :Dq].set(wq.astype(f32))

    # ---- activations: pad + lay out lane-dense (T on lanes) -------------------
    memT = jnp.swapaxes(memory, 1, 2)                                # (B, De, T)
    memT_p = jnp.zeros((Bp, Dep, Tp), f32).at[:B, :De, :T].set(memT.astype(f32))
    q_p = jnp.zeros((Bp, 1, Dqp), f32).at[:B, 0, :Dq].set(query.astype(f32))

    x = attn_cum[:, 0, :].astype(f32)                                # (B, T)
    x_zp = jnp.zeros((Bp, Tp + K - 1), f32).at[:B, pad:pad + T].set(x)
    shifted = jnp.stack([x_zp[:, k:k + Tp] for k in range(K)], axis=1)  # (Bp,K,Tp)

    kern = functools.partial(_attention_kernel,
                             b_block=b_block, n_taps=K, t_valid=T)

    w_out, ctx_out = pl.pallas_call(
        kern,
        out_shape=(jax.ShapeDtypeStruct((Bp, 1, Tp), f32),
                   jax.ShapeDtypeStruct((Bp, Dep, 1), f32)),
        grid_spec=pltpu.PrefetchScalarGridSpec(
            num_scalar_prefetch=0,
            grid=(n_steps,),
            in_specs=[
                pl.BlockSpec((b_block, Dep, Tp), lambda i: (i, 0, 0)),
                pl.BlockSpec((b_block, K, Tp), lambda i: (i, 0, 0)),
                pl.BlockSpec((b_block, 1, Dqp), lambda i: (i, 0, 0)),
                pl.BlockSpec((Dp, Dep), lambda i: (0, 0)),
                pl.BlockSpec((Dp, Dqp), lambda i: (0, 0)),
                pl.BlockSpec((K, Dp, 1), lambda i: (0, 0, 0)),
                pl.BlockSpec((Dp, 1), lambda i: (0, 0)),
                pl.BlockSpec((Dp, 1), lambda i: (0, 0)),
            ],
            out_specs=[
                pl.BlockSpec((b_block, 1, Tp), lambda i: (i, 0, 0)),
                pl.BlockSpec((b_block, Dep, 1), lambda i: (i, 0, 0)),
            ]),
        compiler_params=pltpu.CompilerParams(
            dimension_semantics=("parallel",),
            vmem_limit_bytes=32 * 1024 * 1024),
    )(memT_p, shifted, q_p, wm_p, wq_p, wf_p, bsum_p, v_p)

    attention_weights = w_out[:B, 0, :T]
    attention_context = ctx_out[:B, :De, 0]
    return attention_context, attention_weights


def attention_reference(query, memory, attn_cum, params):
    """Plain-JAX reference matching the PyTorch module (mask=None)."""
    wq, bq, wm, bm, conv_w, conv_b, dense_w, v_w, v_b = params
    B, T, De = memory.shape
    F, _, K = conv_w.shape
    pad = (K - 1) // 2
    ein = functools.partial(jnp.einsum, precision='highest')

    key = ein('bte,de->btd', memory, wm) + bm
    q = ein('bq,dq->bd', query, wq) + bq
    xp = jnp.pad(attn_cum[:, 0, :], ((0, 0), (pad, pad)))
    shifted = jnp.stack([xp[:, k:k + T] for k in range(K)], -1)      # (B, T, K)
    conv = ein('btk,fk->btf', shifted, conv_w[:, 0, :]) + conv_b
    loc = ein('btf,df->btd', conv, dense_w)
    energies = ein('btd,d->bt', jnp.tanh(q[:, None, :] + loc + key), v_w[0]) + v_b[0]
    attention_weights = jax.nn.softmax(energies, axis=1)
    context = ein('bt,bte->be', attention_weights, memory)
    return context, attention_weights


if __name__ == "__main__":
    # Small, module-consistent shapes.
    B = 4                       # batch
    T = 16                      # encoder max_time (T_in)
    query_dim = 32              # decoder rnn output dim
    embed_dim = 48              # encoder output dim (De)
    attention_dim = 32          # D
    attention_location_n_filters = 8
    attention_location_kernel_size = 5

    root = jax.random.PRNGKey(0)
    ks = jax.random.split(root, 12)
    query = jax.random.normal(ks[0], (B, query_dim), jnp.float32)
    memory = jax.random.normal(ks[1], (B, T, embed_dim), jnp.float32)
    attn_cum = jax.random.uniform(ks[2], (B, 1, T), dtype=jnp.float32)

    wq = 0.1 * jax.random.normal(ks[3], (attention_dim, query_dim), jnp.float32)
    bq = 0.1 * jax.random.normal(ks[4], (attention_dim,), jnp.float32)
    wm = 0.1 * jax.random.normal(ks[5], (attention_dim, embed_dim), jnp.float32)
    bm = 0.1 * jax.random.normal(ks[6], (attention_dim,), jnp.float32)
    conv_w = 0.1 * jax.random.normal(
        ks[7], (attention_location_n_filters, 1, attention_location_kernel_size),
        jnp.float32)
    conv_b = 0.1 * jax.random.normal(ks[8], (attention_location_n_filters,), jnp.float32)
    dense_w = 0.1 * jax.random.normal(
        ks[9], (attention_dim, attention_location_n_filters), jnp.float32)
    v_w = 0.1 * jax.random.normal(ks[10], (1, attention_dim), jnp.float32)
    v_b = 0.1 * jax.random.normal(ks[11], (1,), jnp.float32)
    params = (wq, bq, wm, bm, conv_w, conv_b, dense_w, v_w, v_b)

    ctx, attn_w = attention_forward(query, memory, attn_cum, params)
    ctx, attn_w = jax.block_until_ready((ctx, attn_w))

    ctx_ref, attn_w_ref = attention_reference(query, memory, attn_cum, params)
    assert ctx.shape == (B, embed_dim)
    assert attn_w.shape == (B, T)
    assert jnp.allclose(attn_w, attn_w_ref, atol=1e-4, rtol=1e-4), \
        float(jnp.max(jnp.abs(attn_w - attn_w_ref)))
    assert jnp.allclose(ctx, ctx_ref, atol=1e-4, rtol=1e-4), \
        float(jnp.max(jnp.abs(ctx - ctx_ref)))

    print("KERNEL_OK")
</pallas_src>

<mosaic_0001>
module attributes {stable_mosaic.version = 11 : i64} {
  func.func @_attention_kernel(%arg0: i32, %arg1: memref<2x48x128xf32, #tpu.memory_space<vmem>>, %arg2: memref<2x5x128xf32, #tpu.memory_space<vmem>>, %arg3: memref<2x1x32xf32, #tpu.memory_space<vmem>>, %arg4: memref<32x48xf32, #tpu.memory_space<vmem>>, %arg5: memref<32x32xf32, #tpu.memory_space<vmem>>, %arg6: memref<5x32x1xf32, #tpu.memory_space<vmem>>, %arg7: memref<32x1xf32, #tpu.memory_space<vmem>>, %arg8: memref<32x1xf32, #tpu.memory_space<vmem>>, %arg9: memref<2x1x128xf32, #tpu.memory_space<vmem>>, %arg10: memref<2x48x1xf32, #tpu.memory_space<vmem>>) attributes {dimension_semantics = [#tpu.dimension_semantics<parallel>], iteration_bounds = array<i64: 2>, scalar_prefetch = 0 : i64, scratch_operands = 0 : i64, tpu.core_type = #tpu.core_type<tc>, window_params = [{transform_indices = @transform_0, window_bounds = array<i64: 2, 48, 128>}, {transform_indices = @transform_1, window_bounds = array<i64: 2, 5, 128>}, {transform_indices = @transform_2, window_bounds = array<i64: 2, 1, 32>}, {pipeline_mode = #tpu.pipeline_mode<synchronous>, transform_indices = @transform_3, window_bounds = array<i64: 32, 48>}, {pipeline_mode = #tpu.pipeline_mode<synchronous>, transform_indices = @transform_4, window_bounds = array<i64: 32, 32>}, {pipeline_mode = #tpu.pipeline_mode<synchronous>, transform_indices = @transform_5, window_bounds = array<i64: 5, 32, 1>}, {pipeline_mode = #tpu.pipeline_mode<synchronous>, transform_indices = @transform_6, window_bounds = array<i64: 32, 1>}, {pipeline_mode = #tpu.pipeline_mode<synchronous>, transform_indices = @transform_7, window_bounds = array<i64: 32, 1>}, {transform_indices = @transform_8, window_bounds = array<i64: 2, 1, 128>}, {transform_indices = @transform_9, window_bounds = array<i64: 2, 48, 1>}]} {
    %c0 = arith.constant 0 : index
    %c0_0 = arith.constant 0 : index
    %0 = vector.load %arg4[%c0, %c0_0] : memref<32x48xf32, #tpu.memory_space<vmem>>, vector<32x48xf32>
    %c0_1 = arith.constant 0 : index
    %c0_2 = arith.constant 0 : index
    %1 = vector.load %arg5[%c0_1, %c0_2] : memref<32x32xf32, #tpu.memory_space<vmem>>, vector<32x32xf32>
    %c0_3 = arith.constant 0 : index
    %c0_4 = arith.constant 0 : index
    %2 = vector.load %arg7[%c0_3, %c0_4] : memref<32x1xf32, #tpu.memory_space<vmem>>, vector<32x1xf32>
    %c0_5 = arith.constant 0 : index
    %c0_6 = arith.constant 0 : index
    %3 = vector.load %arg8[%c0_5, %c0_6] : memref<32x1xf32, #tpu.memory_space<vmem>>, vector<32x1xf32>
    %4 = tpu.iota {dimensions = array<i32: 1>} : vector<1x128xi32>
    %c0_7 = arith.constant 0 : index
    %c0_8 = arith.constant 0 : index
    %c0_9 = arith.constant 0 : index
    %5 = vector.load %arg1[%c0_7, %c0_8, %c0_9] : memref<2x48x128xf32, #tpu.memory_space<vmem>>, vector<1x48x128xf32>
    %6 = vector.shape_cast %5 : vector<1x48x128xf32> to vector<48x128xf32>
    %cst = arith.constant dense<0.000000e+00> : vector<32x128xf32>
    %7 = tpu.matmul %0, %6, %cst {dimension_numbers = #tpu.dot_dimension_numbers<[1], [0], [0], [1], [0, 0, 1, 1], [], []>} : vector<32x48xf32>, vector<48x128xf32>, vector<32x128xf32> -> vector<32x128xf32>
    %c0_10 = arith.constant 0 : index
    %c0_11 = arith.constant 0 : index
    %c0_12 = arith.constant 0 : index
    %8 = vector.load %arg3[%c0_10, %c0_11, %c0_12] : memref<2x1x32xf32, #tpu.memory_space<vmem>>, vector<1x1x32xf32>
    %9 = vector.shape_cast %8 : vector<1x1x32xf32> to vector<1x32xf32>
    %10 = vector.broadcast %9 : vector<1x32xf32> to vector<32x32xf32>
    %11 = arith.mulf %1, %10 : vector<32x32xf32>
    %cst_13 = arith.constant dense<0.000000e+00> : vector<32xf32>
    %12 = vector.multi_reduction <add>, %11, %cst_13 [1] : vector<32x32xf32> to vector<32xf32>
    %13 = vector.shape_cast %12 : vector<32xf32> to vector<32x1xf32>
    %cst_14 = arith.constant 0.000000e+00 : f32
    %14 = vector.broadcast %cst_14 : f32 to vector<32x128xf32>
    %c0_15 = arith.constant 0 : index
    %c0_16 = arith.constant 0 : index
    %c0_17 = arith.constant 0 : index
    %15 = vector.load %arg6[%c0_15, %c0_16, %c0_17] : memref<5x32x1xf32, #tpu.memory_space<vmem>>, vector<1x32x1xf32>
    %16 = vector.shape_cast %15 : vector<1x32x1xf32> to vector<32x1xf32>
    %c0_18 = arith.constant 0 : index
    %c0_19 = arith.constant 0 : index
    %c0_20 = arith.constant 0 : index
    %17 = vector.load %arg2[%c0_18, %c0_19, %c0_20] : memref<2x5x128xf32, #tpu.memory_space<vmem>>, vector<1x1x128xf32>
    %18 = vector.shape_cast %17 : vector<1x1x128xf32> to vector<1x128xf32>
    %19 = vector.broadcast %16 : vector<32x1xf32> to vector<32x128xf32>
    %20 = vector.broadcast %18 : vector<1x128xf32> to vector<32x128xf32>
    %21 = arith.mulf %19, %20 : vector<32x128xf32>
    %22 = arith.addf %14, %21 : vector<32x128xf32>
    %c1 = arith.constant 1 : index
    %c0_21 = arith.constant 0 : index
    %c0_22 = arith.constant 0 : index
    %23 = vector.load %arg6[%c1, %c0_21, %c0_22] : memref<5x32x1xf32, #tpu.memory_space<vmem>>, vector<1x32x1xf32>
    %24 = vector.shape_cast %23 : vector<1x32x1xf32> to vector<32x1xf32>
    %c0_23 = arith.constant 0 : index
    %c1_24 = arith.constant 1 : index
    %c0_25 = arith.constant 0 : index
    %25 = vector.load %arg2[%c0_23, %c1_24, %c0_25] : memref<2x5x128xf32, #tpu.memory_space<vmem>>, vector<1x1x128xf32>
    %26 = vector.shape_cast %25 : vector<1x1x128xf32> to vector<1x128xf32>
    %27 = vector.broadcast %24 : vector<32x1xf32> to vector<32x128xf32>
    %28 = vector.broadcast %26 : vector<1x128xf32> to vector<32x128xf32>
    %29 = arith.mulf %27, %28 : vector<32x128xf32>
    %30 = arith.addf %22, %29 : vector<32x128xf32>
    %c2 = arith.constant 2 : index
    %c0_26 = arith.constant 0 : index
    %c0_27 = arith.constant 0 : index
    %31 = vector.load %arg6[%c2, %c0_26, %c0_27] : memref<5x32x1xf32, #tpu.memory_space<vmem>>, vector<1x32x1xf32>
    %32 = vector.shape_cast %31 : vector<1x32x1xf32> to vector<32x1xf32>
    %c0_28 = arith.constant 0 : index
    %c2_29 = arith.constant 2 : index
    %c0_30 = arith.constant 0 : index
    %33 = vector.load %arg2[%c0_28, %c2_29, %c0_30] : memref<2x5x128xf32, #tpu.memory_space<vmem>>, vector<1x1x128xf32>
    %34 = vector.shape_cast %33 : vector<1x1x128xf32> to vector<1x128xf32>
    %35 = vector.broadcast %32 : vector<32x1xf32> to vector<32x128xf32>
    %36 = vector.broadcast %34 : vector<1x128xf32> to vector<32x128xf32>
    %37 = arith.mulf %35, %36 : vector<32x128xf32>
    %38 = arith.addf %30, %37 : vector<32x128xf32>
    %c3 = arith.constant 3 : index
    %c0_31 = arith.constant 0 : index
    %c0_32 = arith.constant 0 : index
    %39 = vector.load %arg6[%c3, %c0_31, %c0_32] : memref<5x32x1xf32, #tpu.memory_space<vmem>>, vector<1x32x1xf32>
    %40 = vector.shape_cast %39 : vector<1x32x1xf32> to vector<32x1xf32>
    %c0_33 = arith.constant 0 : index
    %c3_34 = arith.constant 3 : index
    %c0_35 = arith.constant 0 : index
    %41 = vector.load %arg2[%c0_33, %c3_34, %c0_35] : memref<2x5x128xf32, #tpu.memory_space<vmem>>, vector<1x1x128xf32>
    %42 = vector.shape_cast %41 : vector<1x1x128xf32> to vector<1x128xf32>
    %43 = vector.broadcast %40 : vector<32x1xf32> to vector<32x128xf32>
    %44 = vector.broadcast %42 : vector<1x128xf32> to vector<32x128xf32>
    %45 = arith.mulf %43, %44 : vector<32x128xf32>
    %46 = arith.addf %38, %45 : vector<32x128xf32>
    %c4 = arith.constant 4 : index
    %c0_36 = arith.constant 0 : index
    %c0_37 = arith.constant 0 : index
    %47 = vector.load %arg6[%c4, %c0_36, %c0_37] : memref<5x32x1xf32, #tpu.memory_space<vmem>>, vector<1x32x1xf32>
    %48 = vector.shape_cast %47 : vector<1x32x1xf32> to vector<32x1xf32>
    %c0_38 = arith.constant 0 : index
    %c4_39 = arith.constant 4 : index
    %c0_40 = arith.constant 0 : index
    %49 = vector.load %arg2[%c0_38, %c4_39, %c0_40] : memref<2x5x128xf32, #tpu.memory_space<vmem>>, vector<1x1x128xf32>
    %50 = vector.shape_cast %49 : vector<1x1x128xf32> to vector<1x128xf32>
    %51 = vector.broadcast %48 : vector<32x1xf32> to vector<32x128xf32>
    %52 = vector.broadcast %50 : vector<1x128xf32> to vector<32x128xf32>
    %53 = arith.mulf %51, %52 : vector<32x128xf32>
    %54 = arith.addf %46, %53 : vector<32x128xf32>
    %55 = arith.addf %7, %54 : vector<32x128xf32>
    %56 = vector.broadcast %13 : vector<32x1xf32> to vector<32x128xf32>
    %57 = arith.addf %55, %56 : vector<32x128xf32>
    %58 = vector.broadcast %2 : vector<32x1xf32> to vector<32x128xf32>
    %59 = arith.addf %57, %58 : vector<32x128xf32>
    %60 = math.tanh %59 : vector<32x128xf32>
    %61 = vector.broadcast %3 : vector<32x1xf32> to vector<32x128xf32>
    %62 = arith.mulf %60, %61 : vector<32x128xf32>
    %cst_41 = arith.constant dense<0.000000e+00> : vector<128xf32>
    %63 = vector.multi_reduction <add>, %62, %cst_41 [0] : vector<32x128xf32> to vector<128xf32>
    %64 = vector.shape_cast %63 : vector<128xf32> to vector<1x128xf32>
    %c16_i32 = arith.constant 16 : i32
    %65 = vector.broadcast %c16_i32 : i32 to vector<1x128xi32>
    %66 = arith.cmpi slt, %4, %65 : vector<1x128xi32>
    %cst_42 = arith.constant -1.000000e+30 : f32
    %67 = vector.broadcast %cst_42 : f32 to vector<1x128xf32>
    %68 = arith.select %66, %64, %67 : vector<1x128xi1>, vector<1x128xf32>
    %cst_43 = arith.constant dense<0xFF800000> : vector<1xf32>
    %69 = vector.multi_reduction <maximumf>, %68, %cst_43 [1] : vector<1x128xf32> to vector<1xf32>
    %70 = vector.shape_cast %69 : vector<1xf32> to vector<1x1xf32>
    %71 = vector.broadcast %70 : vector<1x1xf32> to vector<1x128xf32>
    %72 = arith.subf %68, %71 : vector<1x128xf32>
    %73 = math.exp %72 : vector<1x128xf32>
    %cst_44 = arith.constant dense<0.000000e+00> : vector<1xf32>
    %74 = vector.multi_reduction <add>, %73, %cst_44 [1] : vector<1x128xf32> to vector<1xf32>
    %75 = vector.shape_cast %74 : vector<1xf32> to vector<1x1xf32>
    %76 = vector.broadcast %75 : vector<1x1xf32> to vector<1x128xf32>
    %77 = arith.divf %73, %76 : vector<1x128xf32>
    %c0_45 = arith.constant 0 : index
    %c0_46 = arith.constant 0 : index
    %c0_47 = arith.constant 0 : index
    %78 = vector.load %arg9[%c0_45, %c0_46, %c0_47] : memref<2x1x128xf32, #tpu.memory_space<vmem>>, vector<1x1x128xf32>
    %79 = vector.shape_cast %78 : vector<1x1x128xf32> to vector<1x128xf32>
    %80 = vector.shape_cast %77 : vector<1x128xf32> to vector<1x1x128xf32>
    tpu.vector_store %arg9[%c0_45, %c0_46, %c0_47], %80 {strides = array<i32>} : memref<2x1x128xf32, #tpu.memory_space<vmem>>, vector<1x1x128xf32>,
    %81 = vector.broadcast %77 : vector<1x128xf32> to vector<48x128xf32>
    %82 = arith.mulf %6, %81 : vector<48x128xf32>
    %cst_48 = arith.constant dense<0.000000e+00> : vector<48xf32>
    %83 = vector.multi_reduction <add>, %82, %cst_48 [1] : vector<48x128xf32> to vector<48xf32>
    %84 = vector.shape_cast %83 : vector<48xf32> to vector<48x1xf32>
    %c0_49 = arith.constant 0 : index
    %c0_50 = arith.constant 0 : index
    %c0_51 = arith.constant 0 : index
    %85 = vector.load %arg10[%c0_49, %c0_50, %c0_51] : memref<2x48x1xf32, #tpu.memory_space<vmem>>, vector<1x48x1xf32>
    %86 = vector.shape_cast %85 : vector<1x48x1xf32> to vector<48x1xf32>
    %87 = vector.shape_cast %84 : vector<48x1xf32> to vector<1x48x1xf32>
    tpu.vector_store %arg10[%c0_49, %c0_50, %c0_51], %87 {strides = array<i32>} : memref<2x48x1xf32, #tpu.memory_space<vmem>>, vector<1x48x1xf32>,
    %c1_52 = arith.constant 1 : index
    %c0_53 = arith.constant 0 : index
    %c0_54 = arith.constant 0 : index
    %88 = vector.load %arg1[%c1_52, %c0_53, %c0_54] : memref<2x48x128xf32, #tpu.memory_space<vmem>>, vector<1x48x128xf32>
    %89 = vector.shape_cast %88 : vector<1x48x128xf32> to vector<48x128xf32>
    %cst_55 = arith.constant dense<0.000000e+00> : vector<32x128xf32>
    %90 = tpu.matmul %0, %89, %cst_55 {dimension_numbers = #tpu.dot_dimension_numbers<[1], [0], [0], [1], [0, 0, 1, 1], [], []>} : vector<32x48xf32>, vector<48x128xf32>, vector<32x128xf32> -> vector<32x128xf32>
    %c1_56 = arith.constant 1 : index
    %c0_57 = arith.constant 0 : index
    %c0_58 = arith.constant 0 : index
    %91 = vector.load %arg3[%c1_56, %c0_57, %c0_58] : memref<2x1x32xf32, #tpu.memory_space<vmem>>, vector<1x1x32xf32>
    %92 = vector.shape_cast %91 : vector<1x1x32xf32> to vector<1x32xf32>
    %93 = vector.broadcast %92 : vector<1x32xf32> to vector<32x32xf32>
    %94 = arith.mulf %1, %93 : vector<32x32xf32>
    %cst_59 = arith.constant dense<0.000000e+00> : vector<32xf32>
    %95 = vector.multi_reduction <add>, %94, %cst_59 [1] : vector<32x32xf32> to vector<32xf32>
    %96 = vector.shape_cast %95 : vector<32xf32> to vector<32x1xf32>
    %cst_60 = arith.constant 0.000000e+00 : f32
    %97 = vector.broadcast %cst_60 : f32 to vector<32x128xf32>
    %c0_61 = arith.constant 0 : index
    %c0_62 = arith.constant 0 : index
    %c0_63 = arith.constant 0 : index
    %98 = vector.load %arg6[%c0_61, %c0_62, %c0_63] : memref<5x32x1xf32, #tpu.memory_space<vmem>>, vector<1x32x1xf32>
    %99 = vector.shape_cast %98 : vector<1x32x1xf32> to vector<32x1xf32>
    %c1_64 = arith.constant 1 : index
    %c0_65 = arith.constant 0 : index
    %c0_66 = arith.constant 0 : index
    %100 = vector.load %arg2[%c1_64, %c0_65, %c0_66] : memref<2x5x128xf32, #tpu.memory_space<vmem>>, vector<1x1x128xf32>
    %101 = vector.shape_cast %100 : vector<1x1x128xf32> to vector<1x128xf32>
    %102 = vector.broadcast %99 : vector<32x1xf32> to vector<32x128xf32>
    %103 = vector.broadcast %101 : vector<1x128xf32> to vector<32x128xf32>
    %104 = arith.mulf %102, %103 : vector<32x128xf32>
    %105 = arith.addf %97, %104 : vector<32x128xf32>
    %c1_67 = arith.constant 1 : index
    %c0_68 = arith.constant 0 : index
    %c0_69 = arith.constant 0 : index
    %106 = vector.load %arg6[%c1_67, %c0_68, %c0_69] : memref<5x32x1xf32, #tpu.memory_space<vmem>>, vector<1x32x1xf32>
    %107 = vector.shape_cast %106 : vector<1x32x1xf32> to vector<32x1xf32>
    %c1_70 = arith.constant 1 : index
    %c1_71 = arith.constant 1 : index
    %c0_72 = arith.constant 0 : index
    %108 = vector.load %arg2[%c1_70, %c1_71, %c0_72] : memref<2x5x128xf32, #tpu.memory_space<vmem>>, vector<1x1x128xf32>
    %109 = vector.shape_cast %108 : vector<1x1x128xf32> to vector<1x128xf32>
    %110 = vector.broadcast %107 : vector<32x1xf32> to vector<32x128xf32>
    %111 = vector.broadcast %109 : vector<1x128xf32> to vector<32x128xf32>
    %112 = arith.mulf %110, %111 : vector<32x128xf32>
    %113 = arith.addf %105, %112 : vector<32x128xf32>
    %c2_73 = arith.constant 2 : index
    %c0_74 = arith.constant 0 : index
    %c0_75 = arith.constant 0 : index
    %114 = vector.load %arg6[%c2_73, %c0_74, %c0_75] : memref<5x32x1xf32, #tpu.memory_space<vmem>>, vector<1x32x1xf32>
    %115 = vector.shape_cast %114 : vector<1x32x1xf32> to vector<32x1xf32>
    %c1_76 = arith.constant 1 : index
    %c2_77 = arith.constant 2 : index
    %c0_78 = arith.constant 0 : index
    %116 = vector.load %arg2[%c1_76, %c2_77, %c0_78] : memref<2x5x128xf32, #tpu.memory_space<vmem>>, vector<1x1x128xf32>
    %117 = vector.shape_cast %116 : vector<1x1x128xf32> to vector<1x128xf32>
    %118 = vector.broadcast %115 : vector<32x1xf32> to vector<32x128xf32>
    %119 = vector.broadcast %117 : vector<1x128xf32> to vector<32x128xf32>
    %120 = arith.mulf %118, %119 : vector<32x128xf32>
    %121 = arith.addf %113, %120 : vector<32x128xf32>
    %c3_79 = arith.constant 3 : index
    %c0_80 = arith.constant 0 : index
    %c0_81 = arith.constant 0 : index
    %122 = vector.load %arg6[%c3_79, %c0_80, %c0_81] : memref<5x32x1xf32, #tpu.memory_space<vmem>>, vector<1x32x1xf32>
    %123 = vector.shape_cast %122 : vector<1x32x1xf32> to vector<32x1xf32>
    %c1_82 = arith.constant 1 : index
    %c3_83 = arith.constant 3 : index
    %c0_84 = arith.constant 0 : index
    %124 = vector.load %arg2[%c1_82, %c3_83, %c0_84] : memref<2x5x128xf32, #tpu.memory_space<vmem>>, vector<1x1x128xf32>
    %125 = vector.shape_cast %124 : vector<1x1x128xf32> to vector<1x128xf32>
    %126 = vector.broadcast %123 : vector<32x1xf32> to vector<32x128xf32>
    %127 = vector.broadcast %125 : vector<1x128xf32> to vector<32x128xf32>
    %128 = arith.mulf %126, %127 : vector<32x128xf32>
    %129 = arith.addf %121, %128 : vector<32x128xf32>
    %c4_85 = arith.constant 4 : index
    %c0_86 = arith.constant 0 : index
    %c0_87 = arith.constant 0 : index
    %130 = vector.load %arg6[%c4_85, %c0_86, %c0_87] : memref<5x32x1xf32, #tpu.memory_space<vmem>>, vector<1x32x1xf32>
    %131 = vector.shape_cast %130 : vector<1x32x1xf32> to vector<32x1xf32>
    %c1_88 = arith.constant 1 : index
    %c4_89 = arith.constant 4 : index
    %c0_90 = arith.constant 0 : index
    %132 = vector.load %arg2[%c1_88, %c4_89, %c0_90] : memref<2x5x128xf32, #tpu.memory_space<vmem>>, vector<1x1x128xf32>
    %133 = vector.shape_cast %132 : vector<1x1x128xf32> to vector<1x128xf32>
    %134 = vector.broadcast %131 : vector<32x1xf32> to vector<32x128xf32>
    %135 = vector.broadcast %133 : vector<1x128xf32> to vector<32x128xf32>
    %136 = arith.mulf %134, %135 : vector<32x128xf32>
    %137 = arith.addf %129, %136 : vector<32x128xf32>
    %138 = arith.addf %90, %137 : vector<32x128xf32>
    %139 = vector.broadcast %96 : vector<32x1xf32> to vector<32x128xf32>
    %140 = arith.addf %138, %139 : vector<32x128xf32>
    %141 = vector.broadcast %2 : vector<32x1xf32> to vector<32x128xf32>
    %142 = arith.addf %140, %141 : vector<32x128xf32>
    %143 = math.tanh %142 : vector<32x128xf32>
    %144 = vector.broadcast %3 : vector<32x1xf32> to vector<32x128xf32>
    %145 = arith.mulf %143, %144 : vector<32x128xf32>
    %cst_91 = arith.constant dense<0.000000e+00> : vector<128xf32>
    %146 = vector.multi_reduction <add>, %145, %cst_91 [0] : vector<32x128xf32> to vector<128xf32>
    %147 = vector.shape_cast %146 : vector<128xf32> to vector<1x128xf32>
    %c16_i32_92 = arith.constant 16 : i32
    %148 = vector.broadcast %c16_i32_92 : i32 to vector<1x128xi32>
    %149 = arith.cmpi slt, %4, %148 : vector<1x128xi32>
    %cst_93 = arith.constant -1.000000e+30 : f32
    %150 = vector.broadcast %cst_93 : f32 to vector<1x128xf32>
    %151 = arith.select %149, %147, %150 : vector<1x128xi1>, vector<1x128xf32>
    %cst_94 = arith.constant dense<0xFF800000> : vector<1xf32>
    %152 = vector.multi_reduction <maximumf>, %151, %cst_94 [1] : vector<1x128xf32> to vector<1xf32>
    %153 = vector.shape_cast %152 : vector<1xf32> to vector<1x1xf32>
    %154 = vector.broadcast %153 : vector<1x1xf32> to vector<1x128xf32>
    %155 = arith.subf %151, %154 : vector<1x128xf32>
    %156 = math.exp %155 : vector<1x128xf32>
    %cst_95 = arith.constant dense<0.000000e+00> : vector<1xf32>
    %157 = vector.multi_reduction <add>, %156, %cst_95 [1] : vector<1x128xf32> to vector<1xf32>
    %158 = vector.shape_cast %157 : vector<1xf32> to vector<1x1xf32>
    %159 = vector.broadcast %158 : vector<1x1xf32> to vector<1x128xf32>
    %160 = arith.divf %156, %159 : vector<1x128xf32>
    %c1_96 = arith.constant 1 : index
    %c0_97 = arith.constant 0 : index
    %c0_98 = arith.constant 0 : index
    %161 = vector.load %arg9[%c1_96, %c0_97, %c0_98] : memref<2x1x128xf32, #tpu.memory_space<vmem>>, vector<1x1x128xf32>
    %162 = vector.shape_cast %161 : vector<1x1x128xf32> to vector<1x128xf32>
    %163 = vector.shape_cast %160 : vector<1x128xf32> to vector<1x1x128xf32>
    tpu.vector_store %arg9[%c1_96, %c0_97, %c0_98], %163 {strides = array<i32>} : memref<2x1x128xf32, #tpu.memory_space<vmem>>, vector<1x1x128xf32>,
    %164 = vector.broadcast %160 : vector<1x128xf32> to vector<48x128xf32>
    %165 = arith.mulf %89, %164 : vector<48x128xf32>
    %cst_99 = arith.constant dense<0.000000e+00> : vector<48xf32>
    %166 = vector.multi_reduction <add>, %165, %cst_99 [1] : vector<48x128xf32> to vector<48xf32>
    %167 = vector.shape_cast %166 : vector<48xf32> to vector<48x1xf32>
    %c1_100 = arith.constant 1 : index
    %c0_101 = arith.constant 0 : index
    %c0_102 = arith.constant 0 : index
    %168 = vector.load %arg10[%c1_100, %c0_101, %c0_102] : memref<2x48x1xf32, #tpu.memory_space<vmem>>, vector<1x48x1xf32>
    %169 = vector.shape_cast %168 : vector<1x48x1xf32> to vector<48x1xf32>
    %170 = vector.shape_cast %167 : vector<48x1xf32> to vector<1x48x1xf32>
    tpu.vector_store %arg10[%c1_100, %c0_101, %c0_102], %170 {strides = array<i32>} : memref<2x48x1xf32, #tpu.memory_space<vmem>>, vector<1x48x1xf32>,
    return
  }
  func.func @transform_0(%arg0: i32) -> (i32, i32, i32) {
    %c0_i32 = arith.constant 0 : i32
    %c0_i32_0 = arith.constant 0 : i32
    %c0_i32_1 = arith.constant 0 : i32
    return %arg0, %c0_i32, %c0_i32_0 : i32, i32, i32
  }
  func.func @transform_1(%arg0: i32) -> (i32, i32, i32) {
    %c0_i32 = arith.constant 0 : i32
    %c0_i32_0 = arith.constant 0 : i32
    %c0_i32_1 = arith.constant 0 : i32
    return %arg0, %c0_i32, %c0_i32_0 : i32, i32, i32
  }
  func.func @transform_2(%arg0: i32) -> (i32, i32, i32) {
    %c0_i32 = arith.constant 0 : i32
    %c0_i32_0 = arith.constant 0 : i32
    %c0_i32_1 = arith.constant 0 : i32
    return %arg0, %c0_i32, %c0_i32_0 : i32, i32, i32
  }
  func.func @transform_3(%arg0: i32) -> (i32, i32) {
    %c0_i32 = arith.constant 0 : i32
    %c0_i32_0 = arith.constant 0 : i32
    %c0_i32_1 = arith.constant 0 : i32
    return %c0_i32, %c0_i32_0 : i32, i32
  }
  func.func @transform_4(%arg0: i32) -> (i32, i32) {
    %c0_i32 = arith.constant 0 : i32
    %c0_i32_0 = arith.constant 0 : i32
    %c0_i32_1 = arith.constant 0 : i32
    return %c0_i32, %c0_i32_0 : i32, i32
  }
  func.func @transform_5(%arg0: i32) -> (i32, i32, i32) {
    %c0_i32 = arith.constant 0 : i32
    %c0_i32_0 = arith.constant 0 : i32
    %c0_i32_1 = arith.constant 0 : i32
    %c0_i32_2 = arith.constant 0 : i32
    return %c0_i32, %c0_i32_0, %c0_i32_1 : i32, i32, i32
  }
  func.func @transform_6(%arg0: i32) -> (i32, i32) {
    %c0_i32 = arith.constant 0 : i32
    %c0_i32_0 = arith.constant 0 : i32
    %c0_i32_1 = arith.constant 0 : i32
    return %c0_i32, %c0_i32_0 : i32, i32
  }
  func.func @transform_7(%arg0: i32) -> (i32, i32) {
    %c0_i32 = arith.constant 0 : i32
    %c0_i32_0 = arith.constant 0 : i32
    %c0_i32_1 = arith.constant 0 : i32
    return %c0_i32, %c0_i32_0 : i32, i32
  }
  func.func @transform_8(%arg0: i32) -> (i32, i32, i32) {
    %c0_i32 = arith.constant 0 : i32
    %c0_i32_0 = arith.constant 0 : i32
    %c0_i32_1 = arith.constant 0 : i32
    return %arg0, %c0_i32, %c0_i32_0 : i32, i32, i32
  }
  func.func @transform_9(%arg0: i32) -> (i32, i32, i32) {
    %c0_i32 = arith.constant 0 : i32
    %c0_i32_0 = arith.constant 0 : i32
    %c0_i32_1 = arith.constant 0 : i32
    return %arg0, %c0_i32, %c0_i32_0 : i32, i32, i32
  }
}

</mosaic_0001>

<bundles_post_ra>
// kernel: tpu_custom_call.1
= control target key start
LH: loop header
LB: loop body
LE: loop exit
PB: predicated region body
PF: predicated region fallthrough
CT: control target
= control target key end

     0   :  { %15 = vsyncpa [#allocation3], 0  ;;  %s2092_s0 = inlined_call_operand.vmem [shape: f32[4,48,128], index: 0, kind: input, shape index: {}]   ;;  %s2093_s1 = inlined_call_operand.vmem [shape: f32[4,5,128], index: 1, kind: input, shape index: {}]   ;;  %s2094_s2 = inlined_call_operand.vmem [shape: f32[4,1,32], index: 2, kind: input, shape index: {}]   ;;  %s2095_s3 = inlined_call_operand.vmem [shape: f32[32,48], index: 3, kind: input, shape index: {}]   ;;  %s2096_s4 = inlined_call_operand.vmem [shape: f32[32,32], index: 4, kind: input, shape index: {}]   ;;  %s2097_s5 = inlined_call_operand.vmem [shape: f32[5,32,1], index: 5, kind: input, shape index: {}]   ;;  %s2098_s6 = inlined_call_operand.vmem [shape: f32[32,1], index: 6, kind: input, shape index: {}]   ;;  %s2099_s7 = inlined_call_operand.vmem [shape: f32[32,1], index: 7, kind: input, shape index: {}]   ;;  %s2100_s8 = inlined_call_operand.hbm [shape: f32[4,1,128], index: 8, kind: output, shape index: {0}]   ;;  %s2101_s9 = inlined_call_operand.vmem [shape: f32[4,48,1], index: 9, kind: output, shape index: {1}]  }
   0x1   :  { %17 = vsyncpa [#allocation3 + $0x1], 0  ;;  %s1684_s30 = smov 0   ;;  %s1686_s10 = smov 0  }
   0x2   :  { %s1688_s11 = smov 0   ;;  %s1690_s12 = smov 0  }
   0x3 LB: > { %s1705_s13 = sadd.s32 4294967295, %s1628_s12   ;;  %s1328_s14 = sadd.s32 4294967294, %s1628_s12   ;;  %s1628_s12 = sphi %s1690_s12, %s2107_s12   ;;  %s1624_s11 = sphi %s1688_s11, %s2106_s11   ;;  %s1620_s10 = sphi %s1686_s10, %s2105_s10   ;;  %s1616_s30 = sphi %s1684_s30, %s2104_s30  }
   0x4   : > { %s1709_s15 = sadd.s32 1, %s1628_s12   ;;  %s213_s16 = sadd.s32 1, %s1624_s11 }
   0x5   : > { %s210_s17 = ssub.s32 %s1628_s12, %s1709_s15  ;;  %p223_p0 = scmp.ne.s32.totalorder %s1624_s11, %s1620_s10 }
   0x6   : > { %p211_p1 = scmp.eq.s32.totalorder %s210_s17, 0  ;;  %p224_p2 = scmp.eq.s32.totalorder %s1705_s13, 1 }
   0x7   : > { %p229_p3 = scmp.ne.s32.totalorder %s1620_s10, %s1616_s30  ;;  %p230_p4 = scmp.eq.s32.totalorder %s1328_s14, 1 }
   0x8   : > { %s1720_s18 = scalar_select %p211_p1, %s1624_s11, %s213_s16  }
   0x9   : > { %p1722_p5 = por %p224_p2, %p223_p0  ;;  %p1726_p6 = por %p230_p4, %p229_p3 }
   0xa   : > { %p1331_p7 = scmp.ge.s32.totalorder %s1628_s12, 1  ;;  %p316_p8 = scmp.lt.s32.totalorder %s1628_s12, 3 }
   0xc   : > { %p317_p9 = pnand %p1331_p7, %p316_p8 }
   0xd   : > { %s1333_s21 = sshll.u32 (!%p317_p9), %s1705_s13, 1  ;;  %vm631_vm0 = vcmask (!%p317_p9), 392192   ;;  %v394_v0 = vld [vmem:[%s2095_s3] sm:$0xff] (!%p317_p9)  ;;  %v1630_v1 = vmov (!%p317_p9), 0   ;;  %v399_v2 = vld [vmem:[%s2096_s4 + $0x8] sm:$0xff] (!%p317_p9)  ;;  %vm429_vm1 = vcmask (!%p317_p9), 261120  }
   0xe   : > { %320 = sbr.rel (%p317_p9) target bundleno = 812 (0x32c), region = 52  ;;  %p369_p10 = scmp.lt.s32.totalorder (!%p317_p9), %s1333_s21, 3  ;;  %1449 = vmatprep.mubr.msk.f32.mxu0 (!%p317_p9), %vm631_vm0, %v394_v0  ;;  %1467 = vmatprep.mubr.msk.f32.mxu1 (!%p317_p9), %vm631_vm0, %v394_v0  ;;  %v398_v3 = vld [vmem:[%s2096_s4] sm:$0xff] (!%p317_p9)  ;;  %v400_v10 = vld [vmem:[%s2096_s4 + $0x10] sm:$0xff] (!%p317_p9)  ;;  %v401_v31 = vld [vmem:[%s2096_s4 + $0x18] sm:$0xff] (!%p317_p9) }
   0xf   : > { %1540 = vset.pattern.permute.xlu1 (!%p317_p9), %v1630_v1  ;;  %1541 = vset.pattern.permute.xlu0 (!%p317_p9), %v1630_v1  ;;  %v395_v42 = vld [vmem:[%s2095_s3 + $0x8] sm:$0xff] (!%p317_p9)  ;;  %v396_v43 = vld [vmem:[%s2095_s3 + $0x10] sm:$0xff] (!%p317_p9)  ;;  %v397_v44 = vld [vmem:[%s2095_s3 + $0x18] sm:$0xff] (!%p317_p9)  ;;  %s357_s24 = sand.u32 (!%p317_p9), 1, %s1620_s10   ;;  %s1416_s27 = sshll.u32 (!%p317_p9), %s1705_s13, 5 }
  0x10   : > { %v1342_v45 = vld [vmem:[%s2097_s5 + $0x20] sm:$0xff] (!%p317_p9)  ;;  %v1343_v46 = vld [vmem:[%s2097_s5 + $0x28] sm:$0xff] (!%p317_p9)  ;;  %v1344_v49 = vld [vmem:[%s2097_s5 + $0x30] sm:$0xff] (!%p317_p9)  ;;  %s1332_s25 = sshll.u32 (!%p317_p9), %s357_s24, 1  ;;  %s2034_s22 = scalar_lea.sflag (!%p317_p9), [#allocation3], %s357_s24 }
  0x11   : > { %v863_v47 = vld [vmem:[%s2097_s5 + $0x8] sm:$0xff] (!%p317_p9)  ;;  %v442_v48 = vld [vmem:[%s2097_s5] sm:$0xff] (!%p317_p9)  ;;  %v444_v51 = vld [vmem:[%s2097_s5 + $0x10] sm:$0xff] (!%p317_p9)  ;;  %s2009_s26 = scalar_lea.vmem (!%p317_p9), [#allocation2], %s1332_s25  ;;  %s1631_s13 = smov (!%p317_p9), [#allocation2]  }
  0x12   : > { %v1348_v50 = vld [vmem:[%s2097_s5 + $0x48] sm:$0xff] (!%p317_p9)  ;;  %v1347_v52 = vld [vmem:[%s2097_s5 + $0x40] sm:$0xff] (!%p317_p9)  ;;  %v1345_v53 = vld [vmem:[%s2097_s5 + $0x38] sm:$0xff] (!%p317_p9)  ;;  %s1570_s25 = sshll.u32 (!%p317_p9), %s1631_s13, 4  ;;  %s1571_s25 = int_to_ptr.vmem [resolvable:$false] %s1570_s25 }
  0x13   : > { %v1352_v54 = vld [vmem:[%s2097_s5 + $0x60] sm:$0xff] (!%p317_p9)  ;;  %v445_v55 = vld [vmem:[%s2097_s5 + $0x18] sm:$0xff] (!%p317_p9)  ;;  %v1384_v56 = vld [vmem:[%s2097_s5 + $0x50] sm:$0xff] (!%p317_p9) }
  0x14   : > { %v1389_v57 = vld [vmem:[%s2097_s5 + $0x68] sm:$0xff] (!%p317_p9)  ;;  %v1354_v58 = vld [vmem:[%s2097_s5 + $0x70] sm:$0xff] (!%p317_p9)  ;;  %v1350_v60 = vld [vmem:[%s2097_s5 + $0x58] sm:$0xff] (!%p317_p9) }
  0x15   : > { %s2109_s21 = smov (!%p369_p10, %s1333_s21), 3  ;;  %v1358_v59 = vld [vmem:[%s2097_s5 + $0x88] sm:$0xff]  ;;  %v1394_v61 = vld [vmem:[%s2097_s5 + $0x80] sm:$0xff]  ;;  %v1355_v62 = vld [vmem:[%s2097_s5 + $0x78] sm:$0xff] }
  0x16   : > { %s384_s14 = scalar_lea.vmem %s2094_s2, %s2109_s21  ;;  %s1497_s16 = smul.u32 48, %s2109_s21  ;;  %v1396_v63 = vld [vmem:[%s2097_s5 + $0x90] sm:$0xff]  ;;  %v1360_v0 = vld [vmem:[%s2097_s5 + $0x98] sm:$0xff]  ;;  %v402_v1 = vld [vmem:[%s2098_s6] sm:$0xff] }
  0x17   : > { %v1340_v4 = vld [vmem:[%s384_s14] ss:$0 sm:$0xff]  ;;  %v1373_v5 = vld [vmem:[%s384_s14 + $0x1] ss:$0 sm:$0xff]  ;;  %s1336_s28 = sshll.u32 %s2109_s21, 3  ;;  %s2027_s14 = scalar_lea.hbm %s2100_s8, %s1416_s27 }
  0x18   : > { %v426_v6 = vmul.f32 %v1340_v4, %v399_v2  ;;  %s1756_s23 = scalar_lea.vmem %s2092_s0, %s1497_s16  ;;  %v425_v7 = vmul.f32 %v1340_v4, %v398_v3  ;;  %v846_v8 = vmul.f32 %v1373_v5, %v398_v3  ;;  %v847_v9 = vmul.f32 %v1373_v5, %v399_v2  ;;  %v403_v2 = vld [vmem:[%s2098_s6 + $0x8] sm:$0xff]  ;;  %v404_v3 = vld [vmem:[%s2098_s6 + $0x10] sm:$0xff]  ;;  %s1931_s17 = scalar_lea.vmem %s2093_s1, %s1336_s28 }
  0x19   : > { %v1762_v11 = vld [vmem:[%s1756_s23] sm:$0xff]  ;;  %v1765_v12 = vld [vmem:[%s1756_s23 + $0x8] sm:$0xff]  ;;  %v1768_v13 = vld [vmem:[%s1756_s23 + $0x30] sm:$0xff]  ;;  %v427_v24 = vmul.f32 %v1340_v4, %v400_v10  ;;  %v848_v29 = vmul.f32 %v1373_v5, %v400_v10  ;;  %v428_v35 = vmul.f32 %v1340_v4, %v401_v31  ;;  %v849_v39 = vmul.f32 %v1373_v5, %v401_v31  ;;  %s1572_s28 = scalar_lea.vmem %s1571_s25, 64 }
  0x1a   : > { %v433_v14 = vsel %vm429_vm1, %v426_v6, 0.0  ;;  %v430_v15 = vsel %vm429_vm1, %v425_v7, 0.0  ;;  %v1473_v16 = vpack.c.bf16 %v1765_v12, %v1762_v11  ;;  %v1775_v17 = vld [vmem:[%s1756_s23 + $0x38] sm:$0xff]  ;;  %v1778_v18 = vld [vmem:[%s1756_s23 + $0x10] sm:$0xff]  ;;  %v1788_v22 = vld [vmem:[%s1756_s23 + $0x40] sm:$0xff]  ;;  %v850_v26 = vsel %vm429_vm1, %v846_v8, 0.0 }
  0x1b   : > { %v1781_v19 = vld [vmem:[%s1756_s23 + $0x18] sm:$0xff]  ;;  %434 = vadd.xlane.f32.xlu0 %v433_v14  ;;  %431 = vadd.xlane.f32.xlu1 %v430_v15  ;;  %v1485_v20 = vpack.c.bf16 %v1775_v17, %v1768_v13  ;;  %v1791_v23 = vld [vmem:[%s1756_s23 + $0x48] sm:$0xff]  ;;  %v1794_v25 = vld [vmem:[%s1756_s23 + $0x20] sm:$0xff]  ;;  %v853_v27 = vsel %vm429_vm1, %v847_v9, 0.0  ;;  %v436_v36 = vsel %vm429_vm1, %v427_v24, 0.0  ;;  %v856_v37 = vsel %vm429_vm1, %v848_v29, 0.0 }
  0x1c   : > { %v1477_v21 = vpack.c.bf16 %v1781_v19, %v1778_v18  ;;  %1474 = vmatprep.subr.bf16.mxu0 %v1473_v16  ;;  %v1489_v28 = vpack.c.bf16 %v1791_v23, %v1788_v22  ;;  %v1801_v30 = vld [vmem:[%s1756_s23 + $0x28] sm:$0xff]  ;;  %v1807_v32 = vld [vmem:[%s1756_s23 + $0x50] sm:$0xff]  ;;  %v1810_v33 = vld [vmem:[%s1756_s23 + $0x58] sm:$0xff]  ;;  %v1819_v40 = vsel %vm429_vm1, %v849_v39, 0.0  ;;  %v439_v41 = vsel %vm429_vm1, %v428_v35, 0.0 }
  0x1d   : > { %1486 = vmatprep.subr.bf16.mxu1 %v1485_v20  ;;  %1476 = vmatpush3.bf16.msra.mxu0 %v1473_v16  ;;  %v1481_v34 = vpack.c.bf16 %v1801_v30, %v1794_v25  ;;  %v1493_v38 = vpack.c.bf16 %v1810_v33, %v1807_v32  ;;  %v405_v4 = vld [vmem:[%s2098_s6 + $0x18] sm:$0xff]  ;;  %v406_v5 = vld [vmem:[%s2099_s7] sm:$0xff]  ;;  %v407_v6 = vld [vmem:[%s2099_s7 + $0x8] sm:$0xff] }
  0x1e   : > { %1488 = vmatpush3.bf16.msra.mxu1 %v1485_v20  ;;  %1478 = vmatprep.subr.bf16.mxu0 %v1477_v21  ;;  %v408_v7 = vld [vmem:[%s2099_s7 + $0x10] sm:$0xff]  ;;  %v1938_v20 = vld [vmem:[%s1931_s17 + $0x1] ss:$0 sm:$0xff]  ;;  %v1948_v31 = vld [vmem:[%s1931_s17] ss:$0 sm:$0xff] }
  0x1f   : > { %851 = vadd.xlane.f32.xlu0 %v850_v26  ;;  %854 = vadd.xlane.f32.xlu1 %v853_v27  ;;  %v409_v26 = vld [vmem:[%s2099_s7 + $0x18] sm:$0xff] }
  0x20   : > { %1490 = vmatprep.subr.bf16.mxu1 %v1489_v28 }
  0x21   : > { %1480 = vmatpush3.bf16.msra.mxu0 %v1477_v21 }
  0x22   : > { %1492 = vmatpush3.bf16.msra.mxu1 %v1489_v28  ;;  %1482 = vmatprep.subr.bf16.mxu0 %v1481_v34 }
  0x23   : > { %437 = vadd.xlane.f32.xlu0 %v436_v36  ;;  %857 = vadd.xlane.f32.xlu1 %v856_v37  ;;  %v1951_v36 = vld [vmem:[%s1931_s17 + $0x8] ss:$0 sm:$0xff] }
  0x24   : > { %1494 = vmatprep.subr.bf16.mxu1 %v1493_v38 }
  0x25   : > { %1484 = vmatpush3.bf16.msra.mxu0 %v1481_v34 }
  0x26   : > { %1496 = vmatpush3.bf16.msra.mxu1 %v1493_v38 }
  0x27   : > { %440 = vadd.xlane.f32.xlu0 %v439_v41 }
  0x28   : > { %1450 = vmatmul.mubr.msk.f32.vlgmr.msra.gmra.mrb[0].mxu0 %vm631_vm0, %v395_v42 }
  0x29   : > { %1468 = vmatmul.mubr.msk.f32.vlgmr.msra.gmra.mrb[0].mxu1 %vm631_vm0, %v395_v42  ;;  %1452 = vmatprep.mubr.msk.f32.mxu0 %vm631_vm0, %v396_v43  ;;  %v1956_v42 = vld [vmem:[%s1931_s17 + $0x9] ss:$0 sm:$0xff] }
  0x2a   : > { %1470 = vmatprep.mubr.msk.f32.mxu1 %vm631_vm0, %v396_v43 }
  0x2c   : > { %1453 = vmatmul.mubr.msk.f32.gmra.mrb[2].mxu0 %vm631_vm0, %v397_v44 }
  0x2d   : > { %1471 = vmatmul.mubr.msk.f32.gmra.mrb[2].mxu1 %vm631_vm0, %v397_v44 }
  0x34   : > { %487 = vperm.xlu1 %1540, %v1342_v45  }
  0x38   : > { %492 = vperm.xlu1 %1540, %v1343_v46  }
  0x3c   : > { %875 = vperm.xlu1 %1540, %v863_v47  }
  0x3d   : > { %449 = vperm.xlu0 %1541, %v442_v48  }
  0x40   : > { %912 = vperm.xlu1 %1540, %v1343_v46  }
  0x41   : > { %454 = vperm.xlu0 %1541, %v863_v47  }
  0x44   : > { %497 = vperm.xlu1 %1540, %v1344_v49  }
  0x45   : > { %870 = vperm.xlu0 %1541, %v442_v48  }
  0x48   : > { %530 = vperm.xlu1 %1540, %v1348_v50  }
  0x49   : > { %907 = vperm.xlu0 %1541, %v1342_v45  }
  0x4c   : > { %917 = vperm.xlu1 %1540, %v1344_v49  }
  0x4d   : > { %459 = vperm.xlu0 %1541, %v444_v51  }
  0x50   : > { %949 = vperm.xlu1 %1540, %v1348_v50   ;;  %v1962_v50 = vld [vmem:[%s1931_s17 + $0x2] ss:$0 sm:$0xff] }
  0x51   : > { %525 = vperm.xlu0 %1541, %v1347_v52  }
  0x54   : > { %502 = vperm.xlu1 %1540, %v1345_v53  }
  0x55   : > { %880 = vperm.xlu0 %1541, %v444_v51  }
  0x58   : > { %563 = vperm.xlu1 %1540, %v1352_v54  }
  0x59   : > { %944 = vperm.xlu0 %1541, %v1347_v52  }
  0x5c   : > { %922 = vperm.xlu1 %1540, %v1345_v53  }
  0x5d   : > { %464 = vperm.xlu0 %1541, %v445_v55  }
  0x60   : > { %954 = vperm.xlu1 %1540, %v1384_v56  }
  0x61   : > { %535 = vperm.xlu0 %1541, %v1384_v56  }
  0x64   : > { %986 = vperm.xlu1 %1540, %v1389_v57  }
  0x65   : > { %568 = vperm.xlu0 %1541, %v1389_v57  }
  0x68   : > { %573 = vperm.xlu1 %1540, %v1354_v58  }
  0x69   : > { %885 = vperm.xlu0 %1541, %v445_v55  }
  0x6c   : > { %606 = vperm.xlu1 %1540, %v1358_v59  }
  0x6d   : > { %981 = vperm.xlu0 %1541, %v1352_v54  }
  0x70   : > { %991 = vperm.xlu1 %1540, %v1354_v58  }
  0x71   : > { %540 = vperm.xlu0 %1541, %v1350_v60  }
  0x74   : > { %1018 = vperm.xlu1 %1540, %v1394_v61  }
  0x75   : > { %601 = vperm.xlu0 %1541, %v1394_v61  }
  0x78   : > { %578 = vperm.xlu1 %1540, %v1355_v62  }
  0x79   : > { %959 = vperm.xlu0 %1541, %v1350_v60  }
  0x7c   : > { %1028 = vperm.xlu1 %1540, %v1396_v63  }
  0x7d   : > { %1023 = vperm.xlu0 %1541, %v1358_v59   ;;  %v1968_v59 = vld [vmem:[%s1931_s17 + $0xa] ss:$0 sm:$0xff] }
  0x80   : > { %616 = vperm.xlu1 %1540, %v1360_v0  }
  0x81   : > { %611 = vperm.xlu0 %1541, %v1396_v63  }
  0x84   : > { %1033 = vperm.xlu1 %1540, %v1360_v0  }
  0x85   : > { %996 = vperm.xlu0 %1541, %v1355_v62  }
  0x88   : > { %735 = vperm.xlu1 %1540, %v402_v1  }
  0x8c   : > { %740 = vperm.xlu1 %1540, %v403_v2  }
  0x90   : > { %745 = vperm.xlu1 %1540, %v404_v3  }
  0x94   : > { %750 = vperm.xlu1 %1540, %v405_v4  }
  0x98   : > { %763 = vperm.xlu1 %1540, %v406_v5  }
  0x9c   : > { %768 = vperm.xlu1 %1540, %v407_v6   ;;  %v1356_v6 = vld [vmem:[%s1931_s17 + $0x3] ss:$0 sm:$0xff] }
  0xa0   : > { %773 = vperm.xlu1 %1540, %v408_v7  }
  0xa4   : > { %860 = vadd.xlane.f32.xlu0 %v1819_v40 }
  0xa8   : > { %v1919_v8 = vpop.xlane.xlu0 %434  ;;  %v1921_v9 = vpop.xlane.xlu1 %431 }
  0xac   : > { %v1924_v10 = vpop.xlane.xlu0 %851  ;;  %v1926_v14 = vpop.xlane.xlu1 %854 }
  0xb0   : > { %v1933_v15 = vpop.xlane.xlu1 %857  ;;  %v1935_v16 = vpop.xlane.xlu0 %437 }
  0xb4   : > { %v488_v21 = vpop.permute.xlu1 %487  ;;  %v1944_v27 = vpop.xlane.xlu0 %440 }
  0xb5   : > { %v509_v24 = vmul.f32 %v1938_v20, %v488_v21 }
  0xb8   : > { %v493_v28 = vpop.permute.xlu1 %492 }
  0xb9   : > { %v510_v29 = vmul.f32 %v1938_v20, %v493_v28 }
  0xba   : > { %778 = vperm.xlu0 %1541, %v409_v26  }
  0xbc   : > { %v450_v34 = vpop.permute.xlu0 %449  ;;  %v876_v35 = vpop.permute.xlu1 %875 }
  0xbd   : > { %v471_v37 = vmul.f32 %v1948_v31, %v450_v34  ;;  %v893_v38 = vmul.f32 %v1951_v36, %v876_v35 }
  0xbf   : > { %v513_v39 = vadd.f32 %v509_v24, %v471_v37 }
  0xc0   : > { %v455_v40 = vpop.permute.xlu0 %454  ;;  %v913_v41 = vpop.permute.xlu1 %912 }
  0xc1   : > { %v472_v43 = vmul.f32 %v1948_v31, %v455_v40  ;;  %v930_v44 = vmul.f32 %v1956_v42, %v913_v41  ;;  %v1979_v40 = vld [vmem:[%s1931_s17 + $0xb] ss:$0 sm:$0xff] }
  0xc3   : > { %v514_v45 = vadd.f32 %v510_v29, %v472_v43  ;;  %v934_v46 = vadd.f32 %v930_v44, %v893_v38 }
  0xc4   : > { %v871_v47 = vpop.permute.xlu0 %870  ;;  %v498_v48 = vpop.permute.xlu1 %497 }
  0xc5   : > { %v511_v49 = vmul.f32 %v1938_v20, %v498_v48 }
  0xc8   : > { %v908_v51 = vpop.permute.xlu0 %907  ;;  %v531_v52 = vpop.permute.xlu1 %530 }
  0xc9   : > { %v548_v53 = vmul.f32 %v1962_v50, %v531_v52 }
  0xcb   : > { %v552_v54 = vadd.f32 %v548_v53, %v514_v45 }
  0xcc   : > { %v460_v55 = vpop.permute.xlu0 %459  ;;  %v918_v56 = vpop.permute.xlu1 %917 }
  0xcd   : > { %v473_v57 = vmul.f32 %v1948_v31, %v460_v55  ;;  %v931_v58 = vmul.f32 %v1956_v42, %v918_v56 }
  0xcf   : > { %v515_v60 = vadd.f32 %v511_v49, %v473_v57  ;;  %v1361_v57 = vld [vmem:[%s1931_s17 + $0x4] ss:$0 sm:$0xff] }
  0xd0   : > { %v526_v61 = vpop.permute.xlu0 %525  ;;  %v950_v62 = vpop.permute.xlu1 %949 }
  0xd1   : > { %v547_v63 = vmul.f32 %v1962_v50, %v526_v61  ;;  %v967_v0 = vmul.f32 %v1968_v59, %v950_v62 }
  0xd3   : > { %v551_v1 = vadd.f32 %v547_v63, %v513_v39  ;;  %v971_v2 = vadd.f32 %v967_v0, %v934_v46 }
  0xd4   : > { %v881_v3 = vpop.permute.xlu0 %880  ;;  %v503_v4 = vpop.permute.xlu1 %502 }
  0xd5   : > { %v894_v5 = vmul.f32 %v1951_v36, %v881_v3 }
  0xd7   : > { %v935_v7 = vadd.f32 %v931_v58, %v894_v5  ;;  %v929_v5 = vmul.f32 %v1956_v42, %v908_v51 }
  0xd8   : > { %v945_v21 = vpop.permute.xlu0 %944  ;;  %v564_v24 = vpop.permute.xlu1 %563 }
  0xd9   : > { %v585_v26 = vmul.f32 %v1356_v6, %v564_v24 }
  0xdb   : > { %v589_v28 = vadd.f32 %v585_v26, %v551_v1  ;;  %v966_v26 = vmul.f32 %v1968_v59, %v945_v21 }
  0xdc   : > { %v465_v29 = vpop.permute.xlu0 %464  ;;  %v1974_v34 = vpop.permute.xlu1 %922 }
  0xe0   : > { %v536_v35 = vpop.permute.xlu0 %535  ;;  %v955_v37 = vpop.permute.xlu1 %954 }
  0xe1   : > { %v549_v38 = vmul.f32 %v1962_v50, %v536_v35  ;;  %v968_v39 = vmul.f32 %v1968_v59, %v955_v37  ;;  %v1399_v37 = vld [vmem:[%s1931_s17 + $0xc] ss:$0 sm:$0xff]  ;;  %s1215_s17 = sshll.u32 %s2009_s26, 4  ;;  %s2030_s17 = int_to_ptr.vmem [resolvable:$true] %s1215_s17 }
  0xe2   : > { %s1566_s23 = scalar_lea.vmem %s2030_s17, 32  ;;  %p1573_p0 = scmp.lt.s32.totalorder %s2030_s17, %s1571_s25 }
  0xe3   : > { %v553_v41 = vadd.f32 %v549_v38, %v515_v60  ;;  %v972_v43 = vadd.f32 %v968_v39, %v935_v7  ;;  %p1567_p11 = scmp.ne.s32.totalorder %s2030_s17, %s1566_s23  ;;  %p1574_p1 = scmp.lt.s32.totalorder %s1572_s28, %s1566_s23 }
  0xe4   : > { %v569_v44 = vpop.permute.xlu0 %568  ;;  %v987_v45 = vpop.permute.xlu1 %986 }
  0xe5   : > { %v586_v46 = vmul.f32 %v1356_v6, %v569_v44  ;;  %v1004_v48 = vmul.f32 %v1979_v40, %v987_v45  ;;  %p1568_p12 = pnand %p1567_p11, %p1722_p5  ;;  %p1575_p2 = por %p1574_p1, %p1573_p0 }
  0xe7   : > { %v590_v49 = vadd.f32 %v586_v46, %v552_v54  ;;  %v1008_v52 = vadd.f32 %v1004_v48, %v971_v2  ;;  %v892_v2 = vmul.f32 %v1951_v36, %v871_v47  ;;  %p1569_p13 = pneg %p1568_p12 }
  0xe8   : > { %v886_v53 = vpop.permute.xlu0 %885  ;;  %v574_v55 = vpop.permute.xlu1 %573 }
  0xe9   : > { %v587_v56 = vmul.f32 %v1356_v6, %v574_v55  ;;  %v933_v38 = vadd.f32 %v929_v5, %v892_v2  ;;  %v512_v55 = vmul.f32 %v1938_v20, %v503_v4  ;;  %p1576_p3 = pnand %p1575_p2, %p1569_p13 }
  0xeb   : > { %v591_v58 = vadd.f32 %v587_v56, %v553_v41  ;;  %v970_v46 = vadd.f32 %v966_v26, %v933_v38 }
  0xec   : > { %v982_v61 = vpop.permute.xlu0 %981  ;;  %v607_v62 = vpop.permute.xlu1 %606 }
  0xed   : > { %v624_v63 = vmul.f32 %v1361_v57, %v607_v62  ;;  %v1003_v39 = vmul.f32 %v1979_v40, %v982_v61 }
  0xef   : > { %v628_v0 = vadd.f32 %v624_v63, %v590_v49  ;;  %v474_v49 = vmul.f32 %v1948_v31, %v465_v29  ;;  %v1007_v51 = vadd.f32 %v1003_v39, %v970_v46  ;;  %v895_v31 = vmul.f32 %v1951_v36, %v886_v53 }
  0xf0   : > { %v541_v1 = vpop.permute.xlu0 %540  ;;  %v992_v60 = vpop.permute.xlu1 %991 }
  0xf1   : > { %v1005_v3 = vmul.f32 %v1979_v40, %v992_v60  ;;  %v550_v47 = vmul.f32 %v1962_v50, %v541_v1  ;;  %v932_v1 = vmul.f32 %v1956_v42, %v1974_v34 }
  0xf3   : > { %v1009_v7 = vadd.f32 %v1005_v3, %v972_v43 }
  0xf4   : > { %v602_v24 = vpop.permute.xlu0 %601  ;;  %v1019_v54 = vpop.permute.xlu1 %1018 }
  0xf5   : > { %v623_v35 = vmul.f32 %v1361_v57, %v602_v24  ;;  %v1040_v48 = vmul.f32 %v1399_v37, %v1019_v54 }
  0xf7   : > { %v627_v41 = vadd.f32 %v623_v35, %v589_v28  ;;  %v1044_v61 = vadd.f32 %v1040_v48, %v1007_v51  ;;  %v516_v28 = vadd.f32 %v512_v55, %v474_v49 }
  0xf8   : > { %v960_v44 = vpop.permute.xlu0 %959  ;;  %v579_v45 = vpop.permute.xlu1 %578 }
  0xf9   : > { %v588_v5 = vmul.f32 %v1356_v6, %v579_v45  ;;  %v554_v20 = vadd.f32 %v550_v47, %v516_v28  ;;  %v969_v38 = vmul.f32 %v1968_v59, %v960_v44 }
  0xfb   : > { %v1451_v43 = vpop.f32.mrb[0].mxu0 }
  0xfc   : > { %v716_v56 = vadd.f32 %v1451_v43, %v628_v0  ;;  %v1469_v21 = vpop.f32.mrb[0].mxu1  ;;  %v1024_v62 = vpop.permute.xlu0 %1023 }
  0xfd   : > { %v1041_v63 = vmul.f32 %v1399_v37, %v1024_v62  ;;  %v1029_v60 = vpop.permute.xlu1 %1028  ;;  %v710_v3 = vpop.f32.mrb[1].mxu0 }
  0xfe   : > { %v1042_v24 = vmul.f32 %v1399_v37, %v1029_v60  ;;  %v711_v2 = vadd.f32 %v710_v3, %v627_v41  ;;  %v1114_v54 = vpop.f32.mrb[1].mxu1  ;;  %v592_v41 = vadd.f32 %v588_v5, %v554_v20  ;;  %v730_v3 = vadd.f32 %v716_v56, %v1919_v8 }
  0xff   : > { %v1045_v29 = vadd.f32 %v1041_v63, %v1008_v52  ;;  %v1115_v26 = vadd.f32 %v1114_v54, %v1044_v61  ;;  %v1454_v35 = vpop.f32.mrb[2].mxu0  ;;  %v936_v52 = vadd.f32 %v932_v1, %v895_v31 }
 0x100   : > { %v1472_v4 = vpop.f32.mrb[2].mxu1  ;;  %v612_v50 = vpop.permute.xlu0 %611  ;;  %v1046_v0 = vadd.f32 %v1042_v24, %v1009_v7  ;;  %v729_v63 = vadd.f32 %v711_v2, %v1921_v9 }
 0x101   : > { %v1120_v39 = vadd.f32 %v1469_v21, %v1045_v29  ;;  %v625_v46 = vmul.f32 %v1361_v57, %v612_v50  ;;  %v617_v6 = vpop.permute.xlu1 %616  ;;  %v1124_v45 = vpop.f32.mrb[3].mxu1  ;;  %v973_v55 = vadd.f32 %v969_v38, %v936_v52 }
 0x102   : > { %v626_v48 = vmul.f32 %v1361_v57, %v617_v6  ;;  %v1125_v49 = vadd.f32 %v1124_v45, %v1046_v0  ;;  %v720_v36 = vpop.f32.mrb[3].mxu0  ;;  %v1133_v57 = vadd.f32 %v1115_v26, %v1924_v10 }
 0x103   : > { %v629_v53 = vadd.f32 %v625_v46, %v591_v58  ;;  %v1134_v5 = vadd.f32 %v1120_v39, %v1926_v14 }
 0x104   : > { %v630_v51 = vadd.f32 %v626_v48, %v592_v41  ;;  %v997_v43 = vpop.permute.xlu0 %996 }
 0x105   : > { %v1006_v7 = vmul.f32 %v1979_v40, %v997_v43  ;;  %v1034_v47 = vpop.permute.xlu1 %1033  ;;  %v721_v62 = vadd.f32 %v720_v36, %v629_v53 }
 0x106   : > { %v726_v42 = vadd.f32 %v1454_v35, %v630_v51  ;;  %v1043_v59 = vmul.f32 %v1399_v37, %v1034_v47  ;;  %v1135_v37 = vadd.f32 %v1125_v49, %v1933_v15 }
 0x107   : > { %v1010_v34 = vadd.f32 %v1006_v7, %v973_v55  ;;  %v731_v54 = vadd.f32 %v721_v62, %v1935_v16  ;;  %v410_v62 = vlaneseq }
 0x108   : > { %v732_v48 = vadd.f32 %v726_v42, %v1944_v27 }
 0x109   : > { %v1047_v44 = vadd.f32 %v1043_v59, %v1010_v34  ;;  %v736_v21 = vpop.permute.xlu1 %735 }
 0x10a   : > { %v753_v58 = vadd.f32 %v736_v21, %v729_v63  ;;  %v1137_v61 = vadd.f32 %v1133_v57, %v736_v21  ;;  %v411_v57 = vand.u32 127, %v410_v62 }
 0x10b   : > { %v1130_v60 = vadd.f32 %v1472_v4, %v1047_v44 }
 0x10c   : > { %1542 = vtanh.f32 %v753_v58  ;;  %vm794_vm2 = vcmp.lt.s32.totalorder %v411_v57, 16 }
 0x10d   : > { %v741_v28 = vpop.permute.xlu1 %740  ;;  %1544 = vtanh.f32 %v1137_v61 }
 0x10e   : > { %v754_v40 = vadd.f32 %v741_v28, %v730_v3  ;;  %v1138_v24 = vadd.f32 %v1134_v5, %v741_v28 }
 0x110   : > { %1546 = vtanh.f32 %v754_v40 }
 0x111   : > { %v746_v31 = vpop.permute.xlu1 %745  ;;  %1548 = vtanh.f32 %v1138_v24 }
 0x112   : > { %v755_v9 = vadd.f32 %v746_v31, %v731_v54  ;;  %v1139_v10 = vadd.f32 %v1135_v37, %v746_v31 }
 0x114   : > { %1550 = vtanh.f32 %v755_v9 }
 0x115   : > { %v751_v2 = vpop.permute.xlu1 %750  ;;  %1552 = vtanh.f32 %v1139_v10 }
 0x116   : > { %v1543_v56 = vpop.eup %1542  ;;  %v756_v49 = vadd.f32 %v751_v2, %v732_v48 }
 0x117   : > { %v1545_v29 = vpop.eup %1544 }
 0x118   : > { %1554 = vtanh.f32 %v756_v49 }
 0x119   : > { %v764_v8 = vpop.permute.xlu1 %763 }
 0x11a   : > { %v1547_v14 = vpop.eup %1546  ;;  %v781_v20 = vmul.f32 %v1543_v56, %v764_v8  ;;  %v1145_v16 = vmul.f32 %v1545_v29, %v764_v8 }
 0x11b   : > { %v1549_v26 = vpop.eup %1548 }
 0x11d   : > { %v769_v35 = vpop.permute.xlu1 %768 }
 0x11e   : > { %v782_v4 = vmul.f32 %v1547_v14, %v769_v35  ;;  %v1146_v50 = vmul.f32 %v1549_v26, %v769_v35  ;;  %v1551_v15 = vpop.eup %1550 }
 0x11f   : > { %v1553_v38 = vpop.eup %1552 }
 0x120   : > { %v785_v0 = vadd.f32 %v782_v4, %v781_v20  ;;  %v1149_v1 = vadd.f32 %v1146_v50, %v1145_v16 }
 0x121   : > { %v774_v39 = vpop.permute.xlu1 %773 }
 0x122   : > { %v783_v46 = vmul.f32 %v1551_v15, %v774_v39  ;;  %v1147_v6 = vmul.f32 %v1553_v38, %v774_v39  ;;  %v1555_v51 = vpop.eup %1554 }
 0x124   : > { %v786_v45 = vadd.f32 %v785_v0, %v783_v46  ;;  %v1150_v41 = vadd.f32 %v1149_v1, %v1147_v6 }
 0x131   : > { %v861_v36 = vpop.xlane.xlu0 %860 }
 0x132   : > { %v1136_v52 = vadd.f32 %v1130_v60, %v861_v36 }
 0x134   : > { %v1140_v53 = vadd.f32 %v1136_v52, %v751_v2 }
 0x136   : > { %1556 = vtanh.f32 %v1140_v53 }
 0x139   : > { %v779_v43 = vpop.permute.xlu0 %778 }
 0x13a   : > { %v784_v55 = vmul.f32 %v1555_v51, %v779_v43 }
 0x13c   : > { %v787_v7 = vadd.f32 %v786_v45, %v784_v55 }
 0x13e   : > { %v788_v47 = vrot.slane %v787_v7, 4 }
 0x140   : > { %v1557_v34 = vpop.eup %1556  ;;  %v789_v59 = vadd.f32 %v788_v47, %v787_v7 }
 0x141   : > { %v1148_v44 = vmul.f32 %v1557_v34, %v779_v43 }
 0x142   : > { %v790_v21 = vrot.slane %v789_v59, 2 }
 0x143   : > { %v1151_v63 = vadd.f32 %v1150_v41, %v1148_v44 }
 0x144   : > { %v791_v3 = vadd.f32 %v790_v21, %v789_v59 }
 0x145   : > { %v1152_v27 = vrot.slane %v1151_v63, 4 }
 0x146   : > { %v792_v42 = vrot.slane %v791_v3, 1 }
 0x147   : > { %v1153_v58 = vadd.f32 %v1152_v27, %v1151_v63 }
 0x148   : > { %v793_v60 = vadd.f32 %v792_v42, %v791_v3 }
 0x149   : > { %v1154_v61 = vrot.slane %v1153_v58, 2 }
 0x14a   : > { %v795_v28 = vsel %vm794_vm2, %v793_v60, -1e+30 }
 0x14b   : > { %796 = vmax.xlane.f32.xlu1 %v795_v28  ;;  %v1155_v5 = vadd.f32 %v1154_v61, %v1153_v58 }
 0x14d   : > { %v1156_v40 = vrot.slane %v1155_v5, 1 }
 0x14f   : > { %v1157_v24 = vadd.f32 %v1156_v40, %v1155_v5 }
 0x151   : > { %v1158_v54 = vsel %vm794_vm2, %v1157_v24, -1e+30 }
 0x152   : > { %1159 = vmax.xlane.f32.xlu0 %v1158_v54 }
 0x1d8   : > { %v797_v37 = vpop.xlane.xlu1 %796 }
 0x1d9   : > { %v798_v31 = vsub.f32 %v795_v28, %v797_v37 }
 0x1db   : > { %v799_v9 = vmul.f32 1.442695, %v798_v31 }
 0x1dd   : > { %1558 = vpow2.f32 %v799_v9 }
 0x1df   : > { %v1160_v10 = vpop.xlane.xlu0 %1159 }
 0x1e0   : > { %v1161_v2 = vsub.f32 %v1158_v54, %v1160_v10 }
 0x1e2   : > { %v1162_v8 = vmul.f32 1.442695, %v1161_v2 }
 0x1e4   : > { %1560 = vpow2.f32 %v1162_v8 }
 0x1e7   : > { %v1559_v56 = vpop.eup %1558 }
 0x1e8   : > { %801 = vadd.xlane.f32.xlu1 %v1559_v56 }
 0x1ee   : > { %v1561_v29 = vpop.eup %1560 }
 0x1ef   : > { %1164 = vadd.xlane.f32.xlu1 %v1561_v29 }
 0x275   : > { %v802_v14 = vpop.xlane.xlu1 %801 }
 0x276   : > { %1562 = vrcp.f32 %v802_v14 }
 0x27c   : > { %v1165_v26 = vpop.xlane.xlu1 %1164 }
 0x27d   : > { %1564 = vrcp.f32 %v1165_v26 }
 0x280   : > { %v1563_v35 = vpop.eup %1562 }
 0x281   : > { %v804_v20 = vmul.f32 %v1563_v35, %v1559_v56 }
 0x283   : > { %v808_v16 = vmul.f32 %v804_v20, %v1778_v18  ;;  %v806_v4 = vmul.f32 %v804_v20, %v1762_v11  ;;  %805 = vst [vmem:[%s2009_s26] sm:$0x1] %v804_v20  ;;  %v810_v15 = vmul.f32 %v804_v20, %v1794_v25  ;;  %v807_v0 = vmul.f32 %v804_v20, %v1765_v12 }
 0x284   : > { %v809_v11 = vmul.f32 %v804_v20, %v1781_v19  ;;  %v811_v18 = vmul.f32 %v804_v20, %v1801_v30 }
 0x285   : > { %816 = vadd.xlane.f32.xlu0 %v808_v16  ;;  %812 = vadd.xlane.f32.xlu1 %v806_v4 }
 0x287   : > { %v1565_v50 = vpop.eup %1564 }
 0x288   : > { %v1167_v1 = vmul.f32 %v1565_v50, %v1561_v29 }
 0x289   : > { %820 = vadd.xlane.f32.xlu0 %v810_v15  ;;  %814 = vadd.xlane.f32.xlu1 %v807_v0 }
 0x28a   : > { %v1170_v38 = vmul.f32 %v1768_v13, %v1167_v1  ;;  %1404 = vst [vmem:[%s2009_s26 + $0x1] sm:$0x1] %v1167_v1  ;;  %v1172_v39 = vmul.f32 %v1788_v22, %v1167_v1  ;;  %v1171_v12 = vmul.f32 %v1775_v17, %v1167_v1  ;;  %v1174_v25 = vmul.f32 %v1807_v32, %v1167_v1 }
 0x28b   : > { %v1173_v13 = vmul.f32 %v1791_v23, %v1167_v1  ;;  %v1175_v19 = vmul.f32 %v1810_v33, %v1167_v1 }
 0x28d   : > { %818 = vadd.xlane.f32.xlu1 %v809_v11  ;;  %1176 = vadd.xlane.f32.xlu0 %v1170_v38 }
 0x291   : > { %822 = vadd.xlane.f32.xlu1 %v811_v18  ;;  %1180 = vadd.xlane.f32.xlu0 %v1172_v39 }
 0x295   : > { %1178 = vadd.xlane.f32.xlu1 %v1171_v12  ;;  %1184 = vadd.xlane.f32.xlu0 %v1174_v25 }
 0x299   : > { %1182 = vadd.xlane.f32.xlu1 %v1173_v13 }
 0x29d   : > { %1186 = vadd.xlane.f32.xlu1 %v1175_v19 }
 0x29e   : > { %1579 = shalt.err (!%p1576_p3)
}
 0x29f   : > { %s1580_s24 = scalar_lea.hbm %s2027_s14, 32  ;;  %s1584_s29 = scalar_lea.hbm %s2100_s8, 64 }
 0x2a0   : > { %p1581_p4 = scmp.ne.s32.totalorder %s2027_s14, %s1580_s24  ;;  %p1585_p9 = scmp.lt.u32.totalorder %s2027_s14, %s2100_s8 }
 0x2a1   : > { %p1586_p10 = scmp.lt.u32.totalorder %s1584_s29, %s1580_s24  ;;  %p1588_p12 = scmp.lt.u32.totalorder %s1580_s24, %s2027_s14 }
 0x2a2   : > { %p1582_p7 = pnand %p1581_p4, %p1722_p5 }
 0x2a3   : > { %p1587_p11 = por %p1586_p10, %p1585_p9 }
 0x2a4   : > { %p1583_p8 = pneg %p1582_p7 }
 0x2a5   : > { %p1589_p13 = por %p1588_p12, %p1587_p11 }
 0x2a7   : > { %p1590_p0 = pnand %p1589_p13, %p1583_p8 }
 0x2a9   : > { %1593 = shalt.err (!%p1590_p0)
}
 0x2aa   : > { %s1632_s23 = smov 16   ;;  %s1633_s28 = smov 1   ;;  %vm824_vm3 = vcmask 7168  }
 0x2ab   : > { %1498 = dma.vmem_to_hbm [thread:$0]  (%p1722_p5), %s2030_s17, 32, %s2027_s14, %s2034_s22, %s1632_s23, %s1632_s23, %s1633_s28  }
 0x2ac   : > { %s392_s13 = scalar_lea.vmem %s2101_s9, %s1497_s16 }
 0x312   : > { %v817_v17 = vpop.xlane.xlu0 %816  ;;  %v813_v22 = vpop.xlane.xlu1 %812 }
 0x313   : > { %827 = vst.msk [vmem:[%s392_s13 + $0x10] sm:$0xff] %vm824_vm3, %v817_v17  ;;  %825 = vst.msk [vmem:[%s392_s13] sm:$0xff] %vm824_vm3, %v813_v22 }
 0x316   : > { %v821_v23 = vpop.xlane.xlu0 %820  ;;  %v815_v30 = vpop.xlane.xlu1 %814 }
 0x317   : > { %829 = vst.msk [vmem:[%s392_s13 + $0x20] sm:$0xff] %vm824_vm3, %v821_v23  ;;  %826 = vst.msk [vmem:[%s392_s13 + $0x8] sm:$0xff] %vm824_vm3, %v815_v30 }
 0x31a   : > { %v1177_v32 = vpop.xlane.xlu0 %1176  ;;  %v819_v33 = vpop.xlane.xlu1 %818 }
 0x31b   : > { %1405 = vst.msk [vmem:[%s392_s13 + $0x30] sm:$0xff] %vm824_vm3, %v1177_v32  ;;  %828 = vst.msk [vmem:[%s392_s13 + $0x18] sm:$0xff] %vm824_vm3, %v819_v33 }
 0x31e   : > { %v1181_v46 = vpop.xlane.xlu0 %1180  ;;  %v823_v6 = vpop.xlane.xlu1 %822 }
 0x31f   : > { %1407 = vst.msk [vmem:[%s392_s13 + $0x40] sm:$0xff] %vm824_vm3, %v1181_v46  ;;  %830 = vst.msk [vmem:[%s392_s13 + $0x28] sm:$0xff] %vm824_vm3, %v823_v6 }
 0x322   : > { %v1185_v45 = vpop.xlane.xlu0 %1184  ;;  %v1179_v41 = vpop.xlane.xlu1 %1178 }
 0x323   : > { %1409 = vst.msk [vmem:[%s392_s13 + $0x50] sm:$0xff] %vm824_vm3, %v1185_v45  ;;  %1406 = vst.msk [vmem:[%s392_s13 + $0x38] sm:$0xff] %vm824_vm3, %v1179_v41 }
 0x326   : > { %v1183_v48 = vpop.xlane.xlu1 %1182 }
 0x327   : > { %1408 = vst.msk [vmem:[%s392_s13 + $0x48] sm:$0xff] %vm824_vm3, %v1183_v48 }
 0x32a   : > { %v1187_v49 = vpop.xlane.xlu1 %1186 }
 0x32b   : > { %1410 = vst.msk [vmem:[%s392_s13 + $0x58] sm:$0xff] %vm824_vm3, %v1187_v49 }
 0x32c PF: > { %p1504_p5 = scmp.ge.s32.totalorder %s1628_s12, 2  ;;  %s1234_s19 = sand.u32 1, %s1616_s30  }
 0x32d   : > { %s1235_s21 = scalar_lea.sflag [#allocation3], %s1234_s19 }
 0x32e   : > { %p1501_p1 = pnand %p1504_p5, %p1726_p6 }
 0x330   : > { %1611 = dma.done.wait (!%p1501_p1), %s1235_s21, 32  }
 0x331   : > { %1613 = vsyncadd (!%p1501_p1), %s1235_s21, 4294967264  ;;  %p20_p2 = scmp.ge.s32.totalorder %s1709_s15, 4   ;;  %s2104_s30 = smov %s1620_s10 }
 0x332   : > { %s2105_s10 = smov %s1624_s11  ;;  %s2106_s11 = smov %s1720_s18 }
 0x333   : > { %s2107_s12 = smov %s1709_s15  ;;  %22 = sbr.rel (!%p20_p2) target bundleno = 3 (0x3), region = 114 }
 0x33a   :  { %1249 = vsyncpa [#allocation3], 1 }
 0x33b   :  { %1251 = vsyncpa [#allocation3 + $0x1], 1 }

</bundles_post_ra>
